<compile_context>
chip_gen: v5e
topology: v5e:2x2
jax: 0.10.0
libtpu: 0.0.40
codegen_flags: <defaults>
</compile_context>

<pallas_src>
import math
import functools

import numpy as np
import jax
import jax.numpy as jnp
from jax.experimental import pallas as pl
from jax.experimental.pallas import tpu as pltpu


# --------------------------- hardware / budgets ----------------------------- #
def _vmem_capacity_bytes():
    """Physical per-core VMEM; falls back to the smallest current part (v7x)."""
    try:
        info = pltpu.get_tpu_info()
        cap = int(getattr(info, "vmem_capacity_bytes", 0) or 0)
        if cap > 0:
            return cap
    except Exception:  # interpret mode / older runtimes
        pass
    return 64 * 1024 * 1024


def _vmem_limit(need_bytes, cap):
    """Scoped-VMEM limit: chosen blocks + headroom for Mosaic internal scratch."""
    return int(min(cap * 9 // 10, max(need_bytes + (4 << 20), 32 << 20)))


def _divisors(n):
    ds, i = set(), 1
    while i * i <= n:
        if n % i == 0:
            ds.add(i)
            ds.add(n // i)
        i += 1
    return sorted(ds)


def _pick_tile(dim, target, align):
    """Largest tile <= target that divides `dim` and is a multiple of `align`;
    falls back to the full dim (always a legal Pallas block)."""
    if dim <= target:
        return dim
    t = (target // align) * align
    while t >= align:
        if dim % t == 0:
            return t
        t -= align
    return dim


def _dedup(xs):
    seen, out = set(), []
    for x in xs:
        if x not in seen:
            seen.add(x)
            out.append(x)
    return out


# ------------------------ stacked tiled linear kernel ---------------------- #
def _stacked_linear_kernel(x_ref, w_ref, b_ref, o_ref, acc_ref):
    # x: (1, tm, tk) bf16, w: (1, tk, tn) bf16, b: (1, 1, tn) f32
    k_idx = pl.program_id(3)

    @pl.when(k_idx == 0)
    def _():
        acc_ref[...] = jnp.zeros_like(acc_ref)

    acc_ref[...] += jnp.dot(x_ref[0], w_ref[0], preferred_element_type=jnp.float32)

    @pl.when(k_idx == pl.num_programs(3) - 1)
    def _():
        o_ref[0] = (acc_ref[...] + b_ref[0].astype(jnp.float32)).astype(o_ref.dtype)


def _linear_live_bytes(tm, tn, tk, out_bytes):
    x_in = 2 * tm * tk * 2            # bf16, double-buffered
    w_in = 2 * tk * tn * 2
    b_in = 2 * tn * 4
    o_out = 2 * tm * tn * out_bytes
    acc = tm * tn * 4
    return x_in + w_in + b_in + o_out + acc


def _select_linear_tiles(M, Din, Dout, budget, out_bytes):
    # Prefer tn = full Dout (activation fetched once), then large tm / tk
    # (fewer ~0.35us grid steps), subject to the VMEM budget.
    tn_cands = _dedup([Dout] + [_pick_tile(Dout, t, 128) for t in (512, 256, 128)])
    tm_cands = _dedup([_pick_tile(M, t, 8) for t in (512, 256, 128, 64, 32, 16, 8)])
    tk_cands = _dedup([_pick_tile(Din, t, 128) for t in (512, 256, 128)])
    for tn in tn_cands:
        for tm in tm_cands:
            for tk in tk_cands:
                if _linear_live_bytes(tm, tn, tk, out_bytes) <= budget:
                    return tm, tn, tk
    return tm_cands[-1], tn_cands[-1], tk_cands[-1]


def stacked_linear(x, w, b, out_dtype=jnp.float32):
    """x: (P, M, Din) bf16, w: (P, Din, Dout) bf16, b: (P, 1, Dout) f32
       -> (P, M, Dout) out_dtype.  P independent projections per call."""
    P, M, Din = x.shape
    Dout = w.shape[2]
    cap = _vmem_capacity_bytes()
    out_bytes = np.dtype(out_dtype).itemsize
    tm, tn, tk = _select_linear_tiles(M, Din, Dout, cap * 2 // 5, out_bytes)
    grid = (P, M // tm, Dout // tn, Din // tk)
    need = _linear_live_bytes(tm, tn, tk, out_bytes)
    return pl.pallas_call(
        _stacked_linear_kernel,
        out_shape=jax.ShapeDtypeStruct((P, M, Dout), out_dtype),
        grid_spec=pltpu.PrefetchScalarGridSpec(
            num_scalar_prefetch=0,
            grid=grid,
            in_specs=[
                pl.BlockSpec((1, tm, tk), lambda p, i, j, k: (p, i, k)),
                pl.BlockSpec((1, tk, tn), lambda p, i, j, k: (p, k, j)),
                pl.BlockSpec((1, 1, tn), lambda p, i, j, k: (p, 0, j)),
            ],
            out_specs=pl.BlockSpec((1, tm, tn), lambda p, i, j, k: (p, i, j)),
            scratch_shapes=[pltpu.VMEM((tm, tn), jnp.float32)],
        ),
        compiler_params=pltpu.CompilerParams(
            dimension_semantics=("parallel", "parallel", "parallel", "arbitrary"),
            vmem_limit_bytes=_vmem_limit(need, cap),
        ),
    )(x, w, b)


# ----------------------------- attention kernel ---------------------------- #
def _attention_kernel(q_ref, k_ref, v_ref, o_ref, p_ref):
    # q: (Hb, tq, d_k) bf16 (already pre-scaled by 1/sqrt(d_k) via W_q folding)
    # k, v: (Hb, S, d_k) bf16.  Scores contract the last dims (no K transpose).
    scores = jnp.einsum(
        "hqd,hkd->hqk", q_ref[...], k_ref[...],
        preferred_element_type=jnp.float32,
    )
    # TODO(synk): optional `mask` path (masked_fill with -1e9) not wired in;
    #             this is the mask=None forward.
    m = jnp.max(scores, axis=-1, keepdims=True)
    # TODO(synk): if bundle dumps show this EUP-bound on v6e/v7x, a bf16 exp
    #             path (upcast for the row-sum) halves EUP cost there.
    e = jnp.exp(scores - m)                                    # f32 (v5e-safe)
    denom = jnp.sum(e, axis=-1, keepdims=True)
    probs = e * pl.reciprocal(denom, approx=True)              # EUP slot, ~free
    p_ref[...] = probs.astype(p_ref.dtype)
    o_ref[...] = jnp.einsum(
        "hqk,hkd->hqd", probs.astype(jnp.bfloat16), v_ref[...],
        preferred_element_type=jnp.float32,
    ).astype(o_ref.dtype)


def _attn_live_bytes(Hb, tq, S, d_k, probs_bytes, out_bytes):
    interm = 3 * Hb * tq * S * 4               # scores, exp, probs (f32)
    probs_out = 2 * Hb * tq * S * probs_bytes  # double-buffered probs block
    o_out = 2 * Hb * tq * d_k * out_bytes
    kv_in = 2 * 2 * Hb * S * d_k * 2           # K,V bf16, double-buffered
    q_in = 2 * Hb * tq * d_k * 2
    return interm + probs_out + o_out + kv_in + q_in


def _select_attn_tiles(BH, S, d_k, budget, probs_bytes, out_bytes):
    # Cap Hb <= BH/2 so the leading (parallel) grid axis stays >= 2 and can be
    # sharded across v7x's two TensorCores without duplicating K/V fetches.
    hb_cap = max(1, min(8, BH // 2)) if BH >= 2 else 1
    hb_cands = [h for h in range(hb_cap, 0, -1) if BH % h == 0]
    tq_cands = [t for t in _divisors(S) if t <= 512 and (t % 8 == 0 or t == S)]
    tq_cands = sorted(tq_cands, reverse=True) or [S]
    for tq in tq_cands:          # larger tq first: fewer grid steps
        for hb in hb_cands:
            if _attn_live_bytes(hb, tq, S, d_k, probs_bytes, out_bytes) <= budget:
                return hb, tq
    # TODO(synk): a flash-style (online-softmax, KV-tiled) fallback would make
    #             VMEM independent of S, but it cannot return the exact full
    #             attn_probs tensor this module's forward contract requires.
    return 1, tq_cands[-1]


def scaled_dot_product_attention(qh, kh, vh, probs_dtype=jnp.float32):
    """qh/kh/vh: (BH, S, d_k) bf16 (qh pre-scaled by 1/sqrt(d_k)).
    Returns (out (BH, S, d_k) bf16, probs (BH, S, S) probs_dtype)."""
    BH, S, d_k = qh.shape
    cap = _vmem_capacity_bytes()
    probs_bytes = np.dtype(probs_dtype).itemsize
    out_bytes = 2  # bf16 attention output (consumed in bf16 by the W_o matmul)
    Hb, tq = _select_attn_tiles(BH, S, d_k, cap * 2 // 5, probs_bytes, out_bytes)
    grid = (BH // Hb, S // tq)
    need = _attn_live_bytes(Hb, tq, S, d_k, probs_bytes, out_bytes)
    # TODO(synk): for d_k < 128 the (tq, d_k) o_ref stores are masked partial
    #             stores; packing Hb heads onto lanes (block (tq, Hb*d_k)) would
    #             make them lane-dense, but reproducing the reference's plain
    #             .view combine_heads would then need an extra HBM transpose
    #             pass.  The dominant store here (probs, last dim S) is already
    #             lane-dense.
    return pl.pallas_call(
        _attention_kernel,
        out_shape=(
            jax.ShapeDtypeStruct((BH, S, d_k), jnp.bfloat16),
            jax.ShapeDtypeStruct((BH, S, S), probs_dtype),
        ),
        grid_spec=pltpu.PrefetchScalarGridSpec(
            num_scalar_prefetch=0,
            grid=grid,
            in_specs=[
                pl.BlockSpec((Hb, tq, d_k), lambda h, i: (h, i, 0)),
                pl.BlockSpec((Hb, S, d_k), lambda h, i: (h, 0, 0)),
                pl.BlockSpec((Hb, S, d_k), lambda h, i: (h, 0, 0)),
            ],
            out_specs=(
                pl.BlockSpec((Hb, tq, d_k), lambda h, i: (h, i, 0)),
                pl.BlockSpec((Hb, tq, S), lambda h, i: (h, i, 0)),
            ),
        ),
        compiler_params=pltpu.CompilerParams(
            dimension_semantics=("parallel", "parallel"),
            vmem_limit_bytes=_vmem_limit(need, cap),
        ),
    )(qh, kh, vh)


# ------------------------------- module glue -------------------------------- #
def init_mha_params(key, d_model):
    """Deterministic nn.Linear-style init: U(-1/sqrt(d), 1/sqrt(d))."""
    bound = 1.0 / math.sqrt(d_model)
    keys = jax.random.split(key, 8)
    params = {}
    for i, name in enumerate(["q", "k", "v", "o"]):
        # stored as (d_in, d_out); the torch weight would be its transpose
        params[f"W{name}"] = jax.random.uniform(
            keys[2 * i], (d_model, d_model), jnp.float32, -bound, bound
        )
        params[f"b{name}"] = jax.random.uniform(
            keys[2 * i + 1], (d_model,), jnp.float32, -bound, bound
        )
    return params


def _split_heads(x2d, B, S, H, d_k):
    # (M, D) -> (B, S, H, d_k) -> (B, H, S, d_k) -> (B*H, S, d_k)   (bf16 in/out)
    # TODO(synk): could be folded into the attention index_maps (reading d_k-
    #             wide column stripes of the projection output) once d_k >= 128
    #             or heads are lane-packed; for small d_k the stripe DMA would
    #             be too narrow.
    return x2d.reshape(B, S, H, d_k).transpose(0, 2, 1, 3).reshape(B * H, S, d_k)


def _mha_attend_and_project(params, qh, kh, vh, B, S, D, H, d_k, M):
    attn_out, probs = scaled_dot_product_attention(qh, kh, vh, probs_dtype=jnp.float32)
    probs = probs.reshape(B, H, S, S)

    # combine_heads: the reference does a plain .view (NO head transpose back)
    # on the (B, H, S, d_k) tensor — reproduce that exact row-major reshape.
    combined = attn_out.reshape(1, M, D)  # bf16, consumed directly by W_o

    out = stacked_linear(
        combined,
        params["Wo"].astype(jnp.bfloat16)[None],
        params["bo"].reshape(1, 1, D),
        out_dtype=jnp.float32,
    )[0].reshape(B, S, D)
    return out, probs


@functools.partial(jax.jit, static_argnames=("num_heads",))
def _mha_forward_cross(params, q, k, v, num_heads):
    B, S, D = q.shape
    H = num_heads
    d_k = D // H
    M = B * S
    scale = 1.0 / math.sqrt(d_k)

    # Fused Q/K/V projections (one tiled pallas_call over a stack of 3).
    # 1/sqrt(d_k) folded into W_q / b_q so scores need no per-element scale.
    w_stack = jnp.stack(
        [params["Wq"] * scale, params["Wk"], params["Wv"]]
    ).astype(jnp.bfloat16)
    b_stack = jnp.stack(
        [params["bq"] * scale, params["bk"], params["bv"]]
    ).reshape(3, 1, D)  # stays f32, added after the f32 accumulation
    x_stack = jnp.stack(
        [q.reshape(M, D), k.reshape(M, D), v.reshape(M, D)]
    ).astype(jnp.bfloat16)
    proj = stacked_linear(x_stack, w_stack, b_stack, out_dtype=jnp.bfloat16)  # (3,M,D)

    qh = _split_heads(proj[0], B, S, H, d_k)
    kh = _split_heads(proj[1], B, S, H, d_k)
    vh = _split_heads(proj[2], B, S, H, d_k)
    return _mha_attend_and_project(params, qh, kh, vh, B, S, D, H, d_k, M)


@functools.partial(jax.jit, static_argnames=("num_heads",))
def _mha_forward_self(params, x, num_heads):
    B, S, D = x.shape
    H = num_heads
    d_k = D // H
    M = B * S
    scale = 1.0 / math.sqrt(d_k)

    # Self-attention fast path: read the activation once against a
    # column-concatenated (D, 3D) weight (no (3, M, D) x_stack materialization).
    w_cat = jnp.concatenate(
        [params["Wq"] * scale, params["Wk"], params["Wv"]], axis=1
    ).astype(jnp.bfloat16)[None]                                        # (1, D, 3D)
    b_cat = jnp.concatenate(
        [params["bq"] * scale, params["bk"], params["bv"]]
    ).reshape(1, 1, 3 * D)                                              # f32
    x2d = x.reshape(M, D).astype(jnp.bfloat16)[None]                    # (1, M, D)
    proj = stacked_linear(x2d, w_cat, b_cat, out_dtype=jnp.bfloat16)[0]  # (M, 3D)

    qh = _split_heads(proj[:, :D], B, S, H, d_k)
    kh = _split_heads(proj[:, D:2 * D], B, S, H, d_k)
    vh = _split_heads(proj[:, 2 * D:], B, S, H, d_k)
    return _mha_attend_and_project(params, qh, kh, vh, B, S, D, H, d_k, M)


def mha_forward(params, q, k, v, num_heads):
    """Forward of MultiHeadAttention (mask=None).  Returns (output, attn_probs)."""
    if q is k and k is v:
        return _mha_forward_self(params, q, num_heads=num_heads)
    return _mha_forward_cross(params, q, k, v, num_heads=num_heads)


# ------------------------------ pure-JAX reference -------------------------- #
def mha_reference(params, q, k, v, num_heads):
    B, S, D = q.shape
    H = num_heads
    d_k = D // H
    qp = q @ params["Wq"] + params["bq"]
    kp = k @ params["Wk"] + params["bk"]
    vp = v @ params["Wv"] + params["bv"]

    def split(x):
        return x.reshape(B, S, H, d_k).transpose(0, 2, 1, 3)

    qh, kh, vh = split(qp), split(kp), split(vp)
    scores = jnp.einsum("bhqd,bhkd->bhqk", qh, kh) / math.sqrt(d_k)
    probs = jax.nn.softmax(scores, axis=-1)
    o = jnp.einsum("bhqk,bhkd->bhqd", probs, vh)
    combined = o.reshape(B, S, D)  # mirrors the reference's plain .view
    out = combined @ params["Wo"] + params["bo"]
    return out, probs


if __name__ == "__main__":
    B, S, D, H = 2, 8, 32, 4  # batch, seq, d_model, num_heads

    key = jax.random.PRNGKey(0)
    kp_, kq_, kk_, kv_ = jax.random.split(key, 4)
    params = init_mha_params(kp_, D)

    q = jax.random.normal(kq_, (B, S, D), jnp.float32)
    k = jax.random.normal(kk_, (B, S, D), jnp.float32)
    v = jax.random.normal(kv_, (B, S, D), jnp.float32)

    # --- cross-attention path (q, k, v distinct) ---
    out, probs = mha_forward(params, q, k, v, H)
    jax.block_until_ready((out, probs))
    assert out.shape == (B, S, D)
    assert probs.shape == (B, H, S, S)
    assert bool(jnp.all(jnp.abs(jnp.sum(probs, axis=-1) - 1.0) < 1e-2))

    out_ref, probs_ref = mha_reference(params, q, k, v, H)
    assert bool(jnp.allclose(out, out_ref, atol=1e-1, rtol=1e-1))
    assert bool(jnp.allclose(probs, probs_ref, atol=5e-2, rtol=5e-2))

    # --- self-attention fast path (q is k is v) ---
    out_s, probs_s = mha_forward(params, q, q, q, H)
    jax.block_until_ready((out_s, probs_s))
    out_sr, probs_sr = mha_reference(params, q, q, q, H)
    assert out_s.shape == (B, S, D) and probs_s.shape == (B, H, S, S)
    assert bool(jnp.allclose(out_s, out_sr, atol=1e-1, rtol=1e-1))
    assert bool(jnp.allclose(probs_s, probs_sr, atol=5e-2, rtol=5e-2))

    print("KERNEL_OK")
</pallas_src>

<mosaic_0001>
module attributes {stable_mosaic.version = 11 : i64} {
  func.func @_stacked_linear_kernel(%arg0: i32, %arg1: i32, %arg2: i32, %arg3: i32, %arg4: memref<1x16x32xbf16, #tpu.memory_space<vmem>>, %arg5: memref<1x32x32xbf16, #tpu.memory_space<vmem>>, %arg6: memref<1x1x32xf32, #tpu.memory_space<vmem>>, %arg7: memref<1x16x32xbf16, #tpu.memory_space<vmem>>, %arg8: memref<16x32xf32, #tpu.memory_space<vmem>>) attributes {dimension_semantics = [#tpu.dimension_semantics<parallel>, #tpu.dimension_semantics<parallel>, #tpu.dimension_semantics<parallel>, #tpu.dimension_semantics<arbitrary>], iteration_bounds = array<i64: 3, 1, 1, 1>, scalar_prefetch = 0 : i64, scratch_operands = 1 : i64, tpu.core_type = #tpu.core_type<tc>, window_params = [{transform_indices = @transform_0, window_bounds = array<i64: 1, 16, 32>}, {transform_indices = @transform_1, window_bounds = array<i64: 1, 32, 32>}, {transform_indices = @transform_2, window_bounds = array<i64: 1, 1, 32>}, {transform_indices = @transform_3, window_bounds = array<i64: 1, 16, 32>}]} {
    %c0_i32 = arith.constant 0 : i32
    %0 = arith.cmpi eq, %arg3, %c0_i32 : i32
    %1 = arith.extui %0 : i1 to i32
    %c0_i32_0 = arith.constant 0 : i32
    %2 = arith.cmpi ne, %1, %c0_i32_0 : i32
    scf.if %2 {
      %cst_12 = arith.constant 0.000000e+00 : f32
      %14 = vector.broadcast %cst_12 : f32 to vector<16x32xf32>
      %c0_13 = arith.constant 0 : index
      %c0_14 = arith.constant 0 : index
      %15 = vector.load %arg8[%c0_13, %c0_14] : memref<16x32xf32, #tpu.memory_space<vmem>>, vector<16x32xf32>
      tpu.vector_store %arg8[%c0_13, %c0_14], %14 {strides = array<i32>} : memref<16x32xf32, #tpu.memory_space<vmem>>, vector<16x32xf32>,
    } else {
    }
    %c0 = arith.constant 0 : index
    %c0_1 = arith.constant 0 : index
    %3 = vector.load %arg8[%c0, %c0_1] : memref<16x32xf32, #tpu.memory_space<vmem>>, vector<16x32xf32>
    %c0_2 = arith.constant 0 : index
    %c0_3 = arith.constant 0 : index
    %c0_4 = arith.constant 0 : index
    %4 = vector.load %arg4[%c0_2, %c0_3, %c0_4] : memref<1x16x32xbf16, #tpu.memory_space<vmem>>, vector<1x16x32xbf16>
    %5 = vector.shape_cast %4 : vector<1x16x32xbf16> to vector<16x32xbf16>
    %c0_5 = arith.constant 0 : index
    %c0_6 = arith.constant 0 : index
    %c0_7 = arith.constant 0 : index
    %6 = vector.load %arg5[%c0_5, %c0_6, %c0_7] : memref<1x32x32xbf16, #tpu.memory_space<vmem>>, vector<1x32x32xbf16>
    %7 = vector.shape_cast %6 : vector<1x32x32xbf16> to vector<32x32xbf16>
    %cst = arith.constant dense<0.000000e+00> : vector<16x32xf32>
    %8 = tpu.matmul %5, %7, %cst {dimension_numbers = #tpu.dot_dimension_numbers<[1], [0], [0], [1], [0, 0, 1, 1], [], []>} : vector<16x32xbf16>, vector<32x32xbf16>, vector<16x32xf32> -> vector<16x32xf32>
    %9 = arith.addf %3, %8 : vector<16x32xf32>
    %c0_8 = arith.constant 0 : index
    %c0_9 = arith.constant 0 : index
    %10 = vector.load %arg8[%c0_8, %c0_9] : memref<16x32xf32, #tpu.memory_space<vmem>>, vector<16x32xf32>
    tpu.vector_store %arg8[%c0_8, %c0_9], %9 {strides = array<i32>} : memref<16x32xf32, #tpu.memory_space<vmem>>, vector<16x32xf32>,
    %c0_i32_10 = arith.constant 0 : i32
    %11 = arith.cmpi eq, %arg3, %c0_i32_10 : i32
    %12 = arith.extui %11 : i1 to i32
    %c0_i32_11 = arith.constant 0 : i32
    %13 = arith.cmpi ne, %12, %c0_i32_11 : i32
    scf.if %13 {
      %c0_12 = arith.constant 0 : index
      %c0_13 = arith.constant 0 : index
      %14 = vector.load %arg8[%c0_12, %c0_13] : memref<16x32xf32, #tpu.memory_space<vmem>>, vector<16x32xf32>
      %c0_14 = arith.constant 0 : index
      %c0_15 = arith.constant 0 : index
      %c0_16 = arith.constant 0 : index
      %15 = vector.load %arg6[%c0_14, %c0_15, %c0_16] : memref<1x1x32xf32, #tpu.memory_space<vmem>>, vector<1x1x32xf32>
      %16 = vector.shape_cast %15 : vector<1x1x32xf32> to vector<1x32xf32>
      %17 = vector.broadcast %16 : vector<1x32xf32> to vector<16x32xf32>
      %18 = arith.addf %14, %17 : vector<16x32xf32>
      %19 = arith.truncf %18 : vector<16x32xf32> to vector<16x32xbf16>
      %c0_17 = arith.constant 0 : index
      %c0_18 = arith.constant 0 : index
      %c0_19 = arith.constant 0 : index
      %20 = vector.load %arg7[%c0_17, %c0_18, %c0_19] : memref<1x16x32xbf16, #tpu.memory_space<vmem>>, vector<1x16x32xbf16>
      %21 = vector.shape_cast %20 : vector<1x16x32xbf16> to vector<16x32xbf16>
      %22 = vector.shape_cast %19 : vector<16x32xbf16> to vector<1x16x32xbf16>
      tpu.vector_store %arg7[%c0_17, %c0_18, %c0_19], %22 {strides = array<i32>} : memref<1x16x32xbf16, #tpu.memory_space<vmem>>, vector<1x16x32xbf16>,
    } else {
    }
    return
  }
  func.func @transform_0(%arg0: i32, %arg1: i32, %arg2: i32, %arg3: i32) -> (i32, i32, i32) {
    %c0_i32 = arith.constant 0 : i32
    return %arg0, %arg1, %arg3 : i32, i32, i32
  }
  func.func @transform_1(%arg0: i32, %arg1: i32, %arg2: i32, %arg3: i32) -> (i32, i32, i32) {
    %c0_i32 = arith.constant 0 : i32
    return %arg0, %arg3, %arg2 : i32, i32, i32
  }
  func.func @transform_2(%arg0: i32, %arg1: i32, %arg2: i32, %arg3: i32) -> (i32, i32, i32) {
    %c0_i32 = arith.constant 0 : i32
    %c0_i32_0 = arith.constant 0 : i32
    return %arg0, %c0_i32, %arg2 : i32, i32, i32
  }
  func.func @transform_3(%arg0: i32, %arg1: i32, %arg2: i32, %arg3: i32) -> (i32, i32, i32) {
    %c0_i32 = arith.constant 0 : i32
    return %arg0, %arg1, %arg2 : i32, i32, i32
  }
}

module attributes {stable_mosaic.version = 11 : i64} {
  func.func @_attention_kernel(%arg0: i32, %arg1: i32, %arg2: memref<4x8x8xbf16, #tpu.memory_space<vmem>>, %arg3: memref<4x8x8xbf16, #tpu.memory_space<vmem>>, %arg4: memref<4x8x8xbf16, #tpu.memory_space<vmem>>, %arg5: memref<4x8x8xbf16, #tpu.memory_space<vmem>>, %arg6: memref<4x8x8xf32, #tpu.memory_space<vmem>>) attributes {dimension_semantics = [#tpu.dimension_semantics<parallel>, #tpu.dimension_semantics<parallel>], iteration_bounds = array<i64: 2, 1>, scalar_prefetch = 0 : i64, scratch_operands = 0 : i64, tpu.core_type = #tpu.core_type<tc>, window_params = [{transform_indices = @transform_0, window_bounds = array<i64: 4, 8, 8>}, {transform_indices = @transform_1, window_bounds = array<i64: 4, 8, 8>}, {transform_indices = @transform_2, window_bounds = array<i64: 4, 8, 8>}, {transform_indices = @transform_3, window_bounds = array<i64: 4, 8, 8>}, {transform_indices = @transform_4, window_bounds = array<i64: 4, 8, 8>}]} {
    %c0 = arith.constant 0 : index
    %c0_0 = arith.constant 0 : index
    %c0_1 = arith.constant 0 : index
    %0 = vector.load %arg2[%c0, %c0_0, %c0_1] : memref<4x8x8xbf16, #tpu.memory_space<vmem>>, vector<4x8x8xbf16>
    %c0_2 = arith.constant 0 : index
    %c0_3 = arith.constant 0 : index
    %c0_4 = arith.constant 0 : index
    %1 = vector.load %arg3[%c0_2, %c0_3, %c0_4] : memref<4x8x8xbf16, #tpu.memory_space<vmem>>, vector<4x8x8xbf16>
    "tpu.trace_start"() <{level = 10 : i32, message = "hqd,hkd->hqk"}> : () -> ()
    %cst = arith.constant dense<0.000000e+00> : vector<4x8x8xf32>
    %2 = tpu.matmul %0, %1, %cst {dimension_numbers = #tpu.dot_dimension_numbers<[2], [2], [1], [1], [0, 0, 0, 1, 1, 1], [0], [0]>} : vector<4x8x8xbf16>, vector<4x8x8xbf16>, vector<4x8x8xf32> -> vector<4x8x8xf32>
    "tpu.trace_stop"() : () -> ()
    %cst_5 = arith.constant dense<0xFF800000> : vector<4x8xf32>
    %3 = vector.multi_reduction <maximumf>, %2, %cst_5 [2] : vector<4x8x8xf32> to vector<4x8xf32>
    %4 = vector.shape_cast %3 : vector<4x8xf32> to vector<4x8x1xf32>
    %5 = vector.broadcast %4 : vector<4x8x1xf32> to vector<4x8x8xf32>
    %6 = arith.subf %2, %5 : vector<4x8x8xf32>
    %7 = math.exp %6 : vector<4x8x8xf32>
    %cst_6 = arith.constant dense<0.000000e+00> : vector<4x8xf32>
    %8 = vector.multi_reduction <add>, %7, %cst_6 [2] : vector<4x8x8xf32> to vector<4x8xf32>
    %9 = vector.shape_cast %8 : vector<4x8xf32> to vector<4x8x1xf32>
    %10 = tpu.reciprocal %9 {approx = true} : vector<4x8x1xf32> -> vector<4x8x1xf32>
    %11 = vector.broadcast %10 : vector<4x8x1xf32> to vector<4x8x8xf32>
    %12 = arith.mulf %7, %11 : vector<4x8x8xf32>
    %c0_7 = arith.constant 0 : index
    %c0_8 = arith.constant 0 : index
    %c0_9 = arith.constant 0 : index
    %13 = vector.load %arg6[%c0_7, %c0_8, %c0_9] : memref<4x8x8xf32, #tpu.memory_space<vmem>>, vector<4x8x8xf32>
    tpu.vector_store %arg6[%c0_7, %c0_8, %c0_9], %12 {strides = array<i32>} : memref<4x8x8xf32, #tpu.memory_space<vmem>>, vector<4x8x8xf32>,
    %14 = arith.truncf %12 : vector<4x8x8xf32> to vector<4x8x8xbf16>
    %c0_10 = arith.constant 0 : index
    %c0_11 = arith.constant 0 : index
    %c0_12 = arith.constant 0 : index
    %15 = vector.load %arg4[%c0_10, %c0_11, %c0_12] : memref<4x8x8xbf16, #tpu.memory_space<vmem>>, vector<4x8x8xbf16>
    "tpu.trace_start"() <{level = 10 : i32, message = "hqk,hkd->hqd"}> : () -> ()
    %cst_13 = arith.constant dense<0.000000e+00> : vector<4x8x8xf32>
    %16 = tpu.matmul %14, %15, %cst_13 {dimension_numbers = #tpu.dot_dimension_numbers<[2], [1], [1], [2], [0, 0, 0, 1, 1, 2], [0], [0]>} : vector<4x8x8xbf16>, vector<4x8x8xbf16>, vector<4x8x8xf32> -> vector<4x8x8xf32>
    "tpu.trace_stop"() : () -> ()
    %17 = arith.truncf %16 : vector<4x8x8xf32> to vector<4x8x8xbf16>
    %c0_14 = arith.constant 0 : index
    %c0_15 = arith.constant 0 : index
    %c0_16 = arith.constant 0 : index
    %18 = vector.load %arg5[%c0_14, %c0_15, %c0_16] : memref<4x8x8xbf16, #tpu.memory_space<vmem>>, vector<4x8x8xbf16>
    tpu.vector_store %arg5[%c0_14, %c0_15, %c0_16], %17 {strides = array<i32>} : memref<4x8x8xbf16, #tpu.memory_space<vmem>>, vector<4x8x8xbf16>,
    return
  }
  func.func @transform_0(%arg0: i32, %arg1: i32) -> (i32, i32, i32) {
    %c0_i32 = arith.constant 0 : i32
    %c0_i32_0 = arith.constant 0 : i32
    return %arg0, %arg1, %c0_i32 : i32, i32, i32
  }
  func.func @transform_1(%arg0: i32, %arg1: i32) -> (i32, i32, i32) {
    %c0_i32 = arith.constant 0 : i32
    %c0_i32_0 = arith.constant 0 : i32
    %c0_i32_1 = arith.constant 0 : i32
    return %arg0, %c0_i32, %c0_i32_0 : i32, i32, i32
  }
  func.func @transform_2(%arg0: i32, %arg1: i32) -> (i32, i32, i32) {
    %c0_i32 = arith.constant 0 : i32
    %c0_i32_0 = arith.constant 0 : i32
    %c0_i32_1 = arith.constant 0 : i32
    return %arg0, %c0_i32, %c0_i32_0 : i32, i32, i32
  }
  func.func @transform_3(%arg0: i32, %arg1: i32) -> (i32, i32, i32) {
    %c0_i32 = arith.constant 0 : i32
    %c0_i32_0 = arith.constant 0 : i32
    return %arg0, %arg1, %c0_i32 : i32, i32, i32
  }
  func.func @transform_4(%arg0: i32, %arg1: i32) -> (i32, i32, i32) {
    %c0_i32 = arith.constant 0 : i32
    %c0_i32_0 = arith.constant 0 : i32
    return %arg0, %arg1, %c0_i32 : i32, i32, i32
  }
}

module attributes {stable_mosaic.version = 11 : i64} {
  func.func @_stacked_linear_kernel(%arg0: i32, %arg1: i32, %arg2: i32, %arg3: i32, %arg4: memref<1x16x32xbf16, #tpu.memory_space<vmem>>, %arg5: memref<1x32x32xbf16, #tpu.memory_space<vmem>>, %arg6: memref<1x1x32xf32, #tpu.memory_space<vmem>>, %arg7: memref<1x16x32xf32, #tpu.memory_space<vmem>>, %arg8: memref<16x32xf32, #tpu.memory_space<vmem>>) attributes {dimension_semantics = [#tpu.dimension_semantics<parallel>, #tpu.dimension_semantics<parallel>, #tpu.dimension_semantics<parallel>, #tpu.dimension_semantics<arbitrary>], iteration_bounds = array<i64: 1, 1, 1, 1>, scalar_prefetch = 0 : i64, scratch_operands = 1 : i64, tpu.core_type = #tpu.core_type<tc>, window_params = [{transform_indices = @transform_0, window_bounds = array<i64: 1, 16, 32>}, {transform_indices = @transform_1, window_bounds = array<i64: 1, 32, 32>}, {transform_indices = @transform_2, window_bounds = array<i64: 1, 1, 32>}, {transform_indices = @transform_3, window_bounds = array<i64: 1, 16, 32>}]} {
    %c0_i32 = arith.constant 0 : i32
    %0 = arith.cmpi eq, %arg3, %c0_i32 : i32
    %1 = arith.extui %0 : i1 to i32
    %c0_i32_0 = arith.constant 0 : i32
    %2 = arith.cmpi ne, %1, %c0_i32_0 : i32
    scf.if %2 {
      %cst_12 = arith.constant 0.000000e+00 : f32
      %14 = vector.broadcast %cst_12 : f32 to vector<16x32xf32>
      %c0_13 = arith.constant 0 : index
      %c0_14 = arith.constant 0 : index
      %15 = vector.load %arg8[%c0_13, %c0_14] : memref<16x32xf32, #tpu.memory_space<vmem>>, vector<16x32xf32>
      tpu.vector_store %arg8[%c0_13, %c0_14], %14 {strides = array<i32>} : memref<16x32xf32, #tpu.memory_space<vmem>>, vector<16x32xf32>,
    } else {
    }
    %c0 = arith.constant 0 : index
    %c0_1 = arith.constant 0 : index
    %3 = vector.load %arg8[%c0, %c0_1] : memref<16x32xf32, #tpu.memory_space<vmem>>, vector<16x32xf32>
    %c0_2 = arith.constant 0 : index
    %c0_3 = arith.constant 0 : index
    %c0_4 = arith.constant 0 : index
    %4 = vector.load %arg4[%c0_2, %c0_3, %c0_4] : memref<1x16x32xbf16, #tpu.memory_space<vmem>>, vector<1x16x32xbf16>
    %5 = vector.shape_cast %4 : vector<1x16x32xbf16> to vector<16x32xbf16>
    %c0_5 = arith.constant 0 : index
    %c0_6 = arith.constant 0 : index
    %c0_7 = arith.constant 0 : index
    %6 = vector.load %arg5[%c0_5, %c0_6, %c0_7] : memref<1x32x32xbf16, #tpu.memory_space<vmem>>, vector<1x32x32xbf16>
    %7 = vector.shape_cast %6 : vector<1x32x32xbf16> to vector<32x32xbf16>
    %cst = arith.constant dense<0.000000e+00> : vector<16x32xf32>
    %8 = tpu.matmul %5, %7, %cst {dimension_numbers = #tpu.dot_dimension_numbers<[1], [0], [0], [1], [0, 0, 1, 1], [], []>} : vector<16x32xbf16>, vector<32x32xbf16>, vector<16x32xf32> -> vector<16x32xf32>
    %9 = arith.addf %3, %8 : vector<16x32xf32>
    %c0_8 = arith.constant 0 : index
    %c0_9 = arith.constant 0 : index
    %10 = vector.load %arg8[%c0_8, %c0_9] : memref<16x32xf32, #tpu.memory_space<vmem>>, vector<16x32xf32>
    tpu.vector_store %arg8[%c0_8, %c0_9], %9 {strides = array<i32>} : memref<16x32xf32, #tpu.memory_space<vmem>>, vector<16x32xf32>,
    %c0_i32_10 = arith.constant 0 : i32
    %11 = arith.cmpi eq, %arg3, %c0_i32_10 : i32
    %12 = arith.extui %11 : i1 to i32
    %c0_i32_11 = arith.constant 0 : i32
    %13 = arith.cmpi ne, %12, %c0_i32_11 : i32
    scf.if %13 {
      %c0_12 = arith.constant 0 : index
      %c0_13 = arith.constant 0 : index
      %14 = vector.load %arg8[%c0_12, %c0_13] : memref<16x32xf32, #tpu.memory_space<vmem>>, vector<16x32xf32>
      %c0_14 = arith.constant 0 : index
      %c0_15 = arith.constant 0 : index
      %c0_16 = arith.constant 0 : index
      %15 = vector.load %arg6[%c0_14, %c0_15, %c0_16] : memref<1x1x32xf32, #tpu.memory_space<vmem>>, vector<1x1x32xf32>
      %16 = vector.shape_cast %15 : vector<1x1x32xf32> to vector<1x32xf32>
      %17 = vector.broadcast %16 : vector<1x32xf32> to vector<16x32xf32>
      %18 = arith.addf %14, %17 : vector<16x32xf32>
      %c0_17 = arith.constant 0 : index
      %c0_18 = arith.constant 0 : index
      %c0_19 = arith.constant 0 : index
      %19 = vector.load %arg7[%c0_17, %c0_18, %c0_19] : memref<1x16x32xf32, #tpu.memory_space<vmem>>, vector<1x16x32xf32>
      %20 = vector.shape_cast %19 : vector<1x16x32xf32> to vector<16x32xf32>
      %21 = vector.shape_cast %18 : vector<16x32xf32> to vector<1x16x32xf32>
      tpu.vector_store %arg7[%c0_17, %c0_18, %c0_19], %21 {strides = array<i32>} : memref<1x16x32xf32, #tpu.memory_space<vmem>>, vector<1x16x32xf32>,
    } else {
    }
    return
  }
  func.func @transform_0(%arg0: i32, %arg1: i32, %arg2: i32, %arg3: i32) -> (i32, i32, i32) {
    %c0_i32 = arith.constant 0 : i32
    return %arg0, %arg1, %arg3 : i32, i32, i32
  }
  func.func @transform_1(%arg0: i32, %arg1: i32, %arg2: i32, %arg3: i32) -> (i32, i32, i32) {
    %c0_i32 = arith.constant 0 : i32
    return %arg0, %arg3, %arg2 : i32, i32, i32
  }
  func.func @transform_2(%arg0: i32, %arg1: i32, %arg2: i32, %arg3: i32) -> (i32, i32, i32) {
    %c0_i32 = arith.constant 0 : i32
    %c0_i32_0 = arith.constant 0 : i32
    return %arg0, %c0_i32, %arg2 : i32, i32, i32
  }
  func.func @transform_3(%arg0: i32, %arg1: i32, %arg2: i32, %arg3: i32) -> (i32, i32, i32) {
    %c0_i32 = arith.constant 0 : i32
    return %arg0, %arg1, %arg2 : i32, i32, i32
  }
}

</mosaic_0001>

<bundles_post_ra>
// kernel: squeeze.4
= control target key start
LH: loop header
LB: loop body
LE: loop exit
PB: predicated region body
PF: predicated region fallthrough
CT: control target
= control target key end

     0   :  { %vm33_vm0 = vcmask 64512   ;;  %s245_s8 = smov 104   ;;  %s246_s9 = smov 112   ;;  %s324_s0 = inlined_call_operand.vmem [shape: bf16[1,16,32], index: 0, kind: input, shape index: {}]   ;;  %s325_s1 = inlined_call_operand.vmem [shape: bf16[2,8,4,8], index: 1, kind: output, shape index: {}]  }
   0x1   :  { %v223_v0 = vld [vmem:[%s324_s0] sm:$0xff]   ;;  %s244_s0 = smov 120  }
   0x2   :  { %v224_v1 = vunpack.c.l.bf16 %v223_v0  ;;  %v225_v2 = vunpack.c.h.bf16 %v223_v0 }
   0x4   :  { %40 = vst.msk [vmem:[#allocation0 + $0x40] ss:$8 sm:$0xf] %vm33_vm0, %v225_v2   ;;  %v229_v3 = vpack.i.bf16 %v225_v2, %v224_v1 }
   0x5   :  { %42 = vst.msk [vmem:[#allocation0 + $0x40] ss:$8 sm:$0xf0] %vm33_vm0, %v225_v2  }
   0x6   :  { %230 = vrot.lane.b32.xlu0 %v229_v3, %s244_s0  ;;  %34 = vst.msk [vmem:[#allocation0] ss:$8 sm:$0xf] %vm33_vm0, %v224_v1   ;;  %240 = vrot.lane.b32.xlu1 %v229_v3, %s245_s8 }
   0x7   :  { %35 = vst.msk [vmem:[#allocation0] ss:$8 sm:$0xf0] %vm33_vm0, %v224_v1  }
   0xe   :  { %235 = vrot.lane.b32.xlu0 %v229_v3, %s246_s9 }
  0x78   :  { %v231_v4 = vpop.permute.xlu0 %230  ;;  %v241_v5 = vpop.permute.xlu1 %240 }
  0x79   :  { %v233_v6 = vunpack.i.h.bf16 %v231_v4  ;;  %v232_v7 = vunpack.i.l.bf16 %v231_v4  ;;  %v243_v8 = vunpack.i.h.bf16 %v241_v5  ;;  %v242_v9 = vunpack.i.l.bf16 %v241_v5 }
  0x7b   :  { %57 = vst.msk [vmem:[#allocation0 + $0x41] ss:$8 sm:$0xf] %vm33_vm0, %v233_v6  }
  0x7c   :  { %59 = vst.msk [vmem:[#allocation0 + $0x41] ss:$8 sm:$0xf0] %vm33_vm0, %v233_v6  }
  0x7d   :  { %48 = vst.msk [vmem:[#allocation0 + $0x1] ss:$8 sm:$0xf] %vm33_vm0, %v232_v7  }
  0x7e   :  { %50 = vst.msk [vmem:[#allocation0 + $0x1] ss:$8 sm:$0xf0] %vm33_vm0, %v232_v7  }
  0x7f   :  { %91 = vst.msk [vmem:[#allocation0 + $0x43] ss:$8 sm:$0xf] %vm33_vm0, %v243_v8  }
  0x80   :  { %93 = vst.msk [vmem:[#allocation0 + $0x43] ss:$8 sm:$0xf0] %vm33_vm0, %v243_v8   ;;  %v236_v10 = vpop.permute.xlu0 %235 }
  0x81   :  { %82 = vst.msk [vmem:[#allocation0 + $0x3] ss:$8 sm:$0xf] %vm33_vm0, %v242_v9   ;;  %v238_v11 = vunpack.i.h.bf16 %v236_v10  ;;  %v237_v12 = vunpack.i.l.bf16 %v236_v10 }
  0x82   :  { %84 = vst.msk [vmem:[#allocation0 + $0x3] ss:$8 sm:$0xf0] %vm33_vm0, %v242_v9  }
  0x83   :  { %74 = vst.msk [vmem:[#allocation0 + $0x42] ss:$8 sm:$0xf] %vm33_vm0, %v238_v11  }
  0x84   :  { %76 = vst.msk [vmem:[#allocation0 + $0x42] ss:$8 sm:$0xf0] %vm33_vm0, %v238_v11  }
  0x85   :  { %65 = vst.msk [vmem:[#allocation0 + $0x2] ss:$8 sm:$0xf] %vm33_vm0, %v237_v12  }
  0x86   :  { %67 = vst.msk [vmem:[#allocation0 + $0x2] ss:$8 sm:$0xf0] %vm33_vm0, %v237_v12  }
  0x8a   :  { %v151_v27 = vld [vmem:[#allocation0 + $0x40] sm:$0xf]  ;;  %v158_v29 = vld [vmem:[#allocation0 + $0x48] sm:$0xf]  ;;  %v165_v31 = vld [vmem:[#allocation0 + $0x50] sm:$0xf] }
  0x8b   :  { %v152_v32 = vpack.c.bf16 0.0, %v151_v27  ;;  %v172_v33 = vld [vmem:[#allocation0 + $0x58] sm:$0xf]  ;;  %v159_v34 = vpack.c.bf16 0.0, %v158_v29  ;;  %v179_v35 = vld [vmem:[#allocation0 + $0x60] sm:$0xf] }
  0x8c   :  { %v96_v13 = vld [vmem:[#allocation0] sm:$0xf]  ;;  %v102_v14 = vld [vmem:[#allocation0 + $0x8] sm:$0xf]  ;;  %v109_v23 = vld [vmem:[#allocation0 + $0x10] sm:$0xf] }
  0x8d   :  { %v123_v15 = vld [vmem:[#allocation0 + $0x20] sm:$0xf]  ;;  %v130_v16 = vld [vmem:[#allocation0 + $0x28] sm:$0xf]  ;;  %v137_v17 = vld [vmem:[#allocation0 + $0x30] sm:$0xf] }
  0x8e   :  { %v124_v18 = vpack.c.bf16 0.0, %v123_v15  ;;  %v131_v19 = vpack.c.bf16 0.0, %v130_v16  ;;  %v138_v20 = vpack.c.bf16 0.0, %v137_v17  ;;  %v144_v21 = vld [vmem:[#allocation0 + $0x38] sm:$0xf]  ;;  %v97_v24 = vpack.c.bf16 0.0, %v96_v13 }
  0x8f   :  { %v145_v22 = vpack.c.bf16 0.0, %v144_v21  ;;  %v116_v25 = vld [vmem:[#allocation0 + $0x18] sm:$0xf]  ;;  %v103_v26 = vpack.c.bf16 0.0, %v102_v14  ;;  %v110_v28 = vpack.c.bf16 0.0, %v109_v23  ;;  %v166_v36 = vpack.c.bf16 0.0, %v165_v31 }
  0x90   :  { %210 = vst [vmem:[%s325_s1 + $0x8] sm:$0x3] %v124_v18  ;;  %v117_v30 = vpack.c.bf16 0.0, %v116_v25  ;;  %v186_v37 = vld [vmem:[#allocation0 + $0x68] sm:$0xf]  ;;  %v173_v38 = vpack.c.bf16 0.0, %v172_v33 }
  0x91   :  { %211 = vst [vmem:[%s325_s1 + $0xa] sm:$0x3] %v131_v19  ;;  %v193_v39 = vld [vmem:[#allocation0 + $0x70] sm:$0xf]  ;;  %v180_v40 = vpack.c.bf16 0.0, %v179_v35  ;;  %v187_v42 = vpack.c.bf16 0.0, %v186_v37 }
  0x92   :  { %212 = vst [vmem:[%s325_s1 + $0xc] sm:$0x3] %v138_v20  ;;  %v200_v41 = vld [vmem:[#allocation0 + $0x78] sm:$0xf]  ;;  %v194_v43 = vpack.c.bf16 0.0, %v193_v39 }
  0x93   :  { %213 = vst [vmem:[%s325_s1 + $0xe] sm:$0x3] %v145_v22  ;;  %v201_v44 = vpack.c.bf16 0.0, %v200_v41 }
  0x94   :  { %100 = vst [vmem:[%s325_s1] sm:$0x3] %v97_v24 }
  0x95   :  { %207 = vst [vmem:[%s325_s1 + $0x2] sm:$0x3] %v103_v26 }
  0x96   :  { %208 = vst [vmem:[%s325_s1 + $0x4] sm:$0x3] %v110_v28 }
  0x97   :  { %209 = vst [vmem:[%s325_s1 + $0x6] sm:$0x3] %v117_v30 }
  0x98   :  { %214 = vst [vmem:[%s325_s1 + $0x10] sm:$0x3] %v152_v32 }
  0x99   :  { %215 = vst [vmem:[%s325_s1 + $0x12] sm:$0x3] %v159_v34 }
  0x9a   :  { %216 = vst [vmem:[%s325_s1 + $0x14] sm:$0x3] %v166_v36 }
  0x9b   :  { %217 = vst [vmem:[%s325_s1 + $0x16] sm:$0x3] %v173_v38 }
  0x9c   :  { %218 = vst [vmem:[%s325_s1 + $0x18] sm:$0x3] %v180_v40 }
  0x9d   :  { %219 = vst [vmem:[%s325_s1 + $0x1a] sm:$0x3] %v187_v42 }
  0x9e   :  { %220 = vst [vmem:[%s325_s1 + $0x1c] sm:$0x3] %v194_v43 }
  0x9f   :  { %221 = vst [vmem:[%s325_s1 + $0x1e] sm:$0x3] %v201_v44 }

// kernel: _mha_forward_cross.3
= control target key start
LH: loop header
LB: loop body
LE: loop exit
PB: predicated region body
PF: predicated region fallthrough
CT: control target
= control target key end

     0   :  { %s628_s12 = smov 0   ;;  %s630_s13 = smov 0   ;;  %s672_s0 = inlined_call_operand.vmem [shape: bf16[3,16,32], index: 0, kind: input, shape index: {}]   ;;  %s673_s1 = inlined_call_operand.vmem [shape: bf16[3,32,32], index: 1, kind: input, shape index: {}]   ;;  %s674_s2 = inlined_call_operand.vmem [shape: f32[3,1,32], index: 2, kind: input, shape index: {}]   ;;  %s675_s3 = inlined_call_operand.vmem [shape: bf16[3,16,32], index: 3, kind: output, shape index: {}]  }
   0x1   :  { %s632_s14 = smov 0  }
   0x2 LB: > { %s39_s15 = sadd.s32 1, %s601_s13  ;;  %p529_p0 = scmp.ge.s32.totalorder %s605_s14, 1  ;;  %s605_s14 = sphi %s632_s14, %s13_s14   ;;  %s601_s13 = sphi %s630_s13, %s677_s13   ;;  %s597_s12 = sphi %s628_s12, %s676_s12  }
   0x3   : > { %p41_p1 = scmp.ge.s32.totalorder %s39_s15, 3  ;;  %p214_p2 = scmp.lt.s32.totalorder %s605_s14, 4 }
   0x5   : > { %s679_s15 = smov (%p41_p1, %s39_s15), 0  ;;  %p215_p3 = pnand %p529_p0, %p214_p2 }
   0x6   : > { %p271_p4 = scmp.lt.s32.totalorder (!%p215_p3), %s597_s12, 2 }
   0x7   : > { %218 = sbr.rel (%p215_p3) target bundleno = 172 (0xac), region = 32 }
   0xc   : > { %vm320_vm0 = vcmask 261120   ;;  %v607_v0 = vmov 0.0   ;;  %s681_s12 = smov (!%p271_p4, %s597_s12), 2  ;;  %vm383_vm1 = vcmask 257024  }
   0xd   : > { %321 = vst.msk [vmem:[#allocation2] sm:$0xff] %vm320_vm0, %v607_v0  ;;  %s552_s16 = sshll.u32 %s681_s12, 4  ;;  %s301_s19 = scalar_lea.vmem %s674_s2, %s681_s12 }
   0xe   : > { %322 = vst.msk [vmem:[#allocation2 + $0x8] sm:$0xff] %vm320_vm0, %v607_v0  ;;  %s294_s22 = scalar_lea.vmem %s673_s1, %s552_s16  ;;  %s551_s23 = sshll.u32 %s681_s12, 3  ;;  %v582_v8 = vld [vmem:[%s301_s19] ss:$0 sm:$0xff] }
   0xf   : > { %v556_v1 = vld [vmem:[%s294_s22 + $0x8] sm:$0xff]  ;;  %v555_v2 = vld [vmem:[%s294_s22] sm:$0xff]  ;;  %s281_s26 = scalar_lea.vmem %s672_s0, %s551_s23  ;;  %s313_s29 = scalar_lea.vmem %s675_s3, %s551_s23 }
  0x10   : > { %358 = vmatpush.bf16.msra.mxu0 %v556_v1  ;;  %v554_v3 = vld [vmem:[%s281_s26] sm:$0xff] }
  0x14   : > { %359 = vmatpush.bf16.msra.mxu0 %v555_v2  ;;  %v323_v4 = vld [vmem:[#allocation2] sm:$0xff] }
  0x15   : > { %v324_v7 = vld [vmem:[#allocation2 + $0x8] sm:$0xff] }
  0x17   : > { %548 = vmatmul.msk.bf16.vlgmr.msra.gmra.mxu0 %vm320_vm0, %v554_v3 }
  0x94   : > { %v361_v5 = vpop.f32.mrf.mxu0 }
  0x95   : > { %v366_v6 = vadd.f32 %v361_v5, %v323_v4 }
  0x97   : > { %368 = vst.msk [vmem:[#allocation2] sm:$0xff] %vm320_vm0, %v366_v6 }
  0x9c   : > { %v363_v9 = vpop.f32.mrf.mxu0 }
  0x9d   : > { %v367_v10 = vadd.f32 %v363_v9, %v324_v7 }
  0x9e   : > { %v373_v11 = vld [vmem:[#allocation2] sm:$0xff] }
  0x9f   : > { %v379_v12 = vadd.f32 %v582_v8, %v373_v11  ;;  %369 = vst.msk [vmem:[#allocation2 + $0x8] sm:$0xff] %vm320_vm0, %v367_v10 }
  0xa1   : > { %v381_v13 = vpack.c.bf16 %v379_v12, %v379_v12 }
  0xa3   : > { %384 = vst.msk [vmem:[%s313_s29] sm:$0xf] %vm383_vm1, %v381_v13 }
  0xa6   : > { %v374_v14 = vld [vmem:[#allocation2 + $0x8] sm:$0xff] }
  0xa7   : > { %v380_v15 = vadd.f32 %v582_v8, %v374_v14 }
  0xa9   : > { %v382_v16 = vpack.c.bf16 %v380_v15, %v380_v15 }
  0xab   : > { %385 = vst.msk [vmem:[%s313_s29 + $0x4] sm:$0xf] %vm383_vm1, %v382_v16 }
  0xac PF: > { %s13_s14 = sadd.s32 1, %s605_s14   ;;  %s676_s12 = smov %s601_s13 }
  0xad   : > { %p10_p5 = scmp.ge.s32.totalorder %s13_s14, 5   ;;  %s677_s13 = smov %s679_s15 }
  0xaf   :  { %12 = sbr.rel (!%p10_p5) target bundleno = 2 (0x2), region = 76 }

// kernel: _mha_forward_cross.5
= control target key start
LH: loop header
LB: loop body
LE: loop exit
PB: predicated region body
PF: predicated region fallthrough
CT: control target
= control target key end

     0   :  { %vm20_vm0 = vcmask 261120   ;;  %v148_v1 = vmov 0.0   ;;  %s194_s0 = inlined_call_operand.vmem [shape: bf16[1,16,32], index: 0, kind: input, shape index: {}]   ;;  %s195_s1 = inlined_call_operand.vmem [shape: bf16[1,32,32], index: 1, kind: input, shape index: {}]   ;;  %s196_s2 = inlined_call_operand.vmem [shape: f32[1,1,32], index: 2, kind: input, shape index: {}]   ;;  %s197_s3 = inlined_call_operand.hbm [shape: f32[1,16,32], index: 3, kind: output, shape index: {}]  }
   0x1   :  { %v116_v0 = vld [vmem:[%s195_s1 + $0x8] sm:$0xff]  ;;  %21 = vst.msk [vmem:[#allocation2] sm:$0xff] %vm20_vm0, %v148_v1 }
   0x2   :  { %8 = vsyncpa [#allocation4], 0  ;;  %58 = vmatpush.bf16.msra.mxu0 %v116_v0  ;;  %v115_v2 = vld [vmem:[%s195_s1] sm:$0xff]  ;;  %22 = vst.msk [vmem:[#allocation2 + $0x8] sm:$0xff] %vm20_vm0, %v148_v1  ;;  %s89_s22 = sshll.u32 %s197_s3, 4  ;;  %s151_s23 = smov 8   ;;  %s90_s22 = int_to_ptr.hbm [resolvable:$true] %s89_s22 }
   0x3   :  { %v114_v3 = vld [vmem:[%s194_s0] sm:$0xff]  ;;  %s149_s0 = smov [#allocation3]  }
   0x4   :  { %v121_v8 = vld [vmem:[%s196_s2] ss:$0 sm:$0xff]  ;;  %s87_s1 = sshll.u32 %s149_s0, 4  ;;  %s150_s2 = smov 128   ;;  %s88_s1 = int_to_ptr.vmem [resolvable:$true] %s87_s1 }
   0x6   :  { %59 = vmatpush.bf16.msra.mxu0 %v115_v2 }
   0x8   :  { %v23_v4 = vld [vmem:[#allocation2] sm:$0xff] }
   0x9   :  { %113 = vmatmul.msk.bf16.vlgmr.msra.gmra.mxu0 %vm20_vm0, %v114_v3  ;;  %v24_v7 = vld [vmem:[#allocation2 + $0x8] sm:$0xff] }
  0x86   :  { %v61_v5 = vpop.f32.mrf.mxu0 }
  0x87   :  { %v66_v6 = vadd.f32 %v61_v5, %v23_v4 }
  0x89   :  { %68 = vst.msk [vmem:[#allocation2] sm:$0xff] %vm20_vm0, %v66_v6 }
  0x8e   :  { %v63_v9 = vpop.f32.mrf.mxu0 }
  0x8f   :  { %v67_v10 = vadd.f32 %v63_v9, %v24_v7 }
  0x90   :  { %v73_v11 = vld [vmem:[#allocation2] sm:$0xff] }
  0x91   :  { %69 = vst.msk [vmem:[#allocation2 + $0x8] sm:$0xff] %vm20_vm0, %v67_v10  ;;  %v79_v12 = vadd.f32 %v121_v8, %v73_v11 }
  0x93   :  { %81 = vst.msk [vmem:[#allocation3] sm:$0xff] %vm20_vm0, %v79_v12 }
  0x98   :  { %v74_v13 = vld [vmem:[#allocation2 + $0x8] sm:$0xff] }
  0x99   :  { %v80_v14 = vadd.f32 %v121_v8, %v74_v13 }
  0x9b   :  { %82 = vst.msk [vmem:[#allocation3 + $0x8] sm:$0xff] %vm20_vm0, %v80_v14 }
  0x9c   :  { %95 = dma.vmem_to_hbm [thread:$0]  %s88_s1, 256, %s90_s22, [#allocation4], %s150_s2, %s150_s2, %s151_s23  }
  0x9d   :  { %146 = dma.done.wait [#allocation4], 256  }
  0x9e   :  { %147 = vsyncadd [#allocation4], 4294967040 }
  0x9f   :  { %100 = vsyncpa [#allocation4], 1 }

// kernel: _mha_forward_cross.4
= control target key start
LH: loop header
LB: loop body
LE: loop exit
PB: predicated region body
PF: predicated region fallthrough
CT: control target
= control target key end

     0   :  { %10 = vsyncpa [#allocation3], 0  ;;  %s1025_s0 = inlined_call_operand.vmem [shape: bf16[8,8,8], index: 0, kind: input, shape index: {}]   ;;  %s1026_s1 = inlined_call_operand.vmem [shape: bf16[8,8,8], index: 1, kind: input, shape index: {}]   ;;  %s1027_s2 = inlined_call_operand.vmem [shape: bf16[8,8,8], index: 2, kind: input, shape index: {}]   ;;  %s1028_s3 = inlined_call_operand.vmem [shape: bf16[8,8,8], index: 3, kind: output, shape index: {0}]   ;;  %s1029_s4 = inlined_call_operand.hbm [shape: f32[8,8,8], index: 4, kind: output, shape index: {1}]  }
   0x1   :  { %12 = vsyncpa [#allocation3 + $0x1], 0  ;;  %s886_s15 = smov 0   ;;  %s888_s16 = smov 0  }
   0x2   :  { %s890_s17 = smov 0   ;;  %s892_s18 = smov 0  }
   0x3   :  { %s894_s19 = smov 0   ;;  %s896_s20 = smov 0  }
   0x4 LB: > { %s678_s21 = sadd.s32 4294967295, %s857_s20   ;;  %s679_s22 = sadd.s32 4294967294, %s857_s20   ;;  %s857_s20 = sphi %s896_s20, %s18_s20   ;;  %s853_s19 = sphi %s894_s19, %s1036_s19   ;;  %s849_s18 = sphi %s892_s18, %s1035_s18   ;;  %s845_s17 = sphi %s890_s17, %s1034_s17   ;;  %s841_s16 = sphi %s888_s16, %s1033_s16   ;;  %s837_s15 = sphi %s886_s15, %s1032_s15  }
   0x5   : > { %s30_s23 = sadd.s32 1, %s853_s19  ;;  %s147_s24 = sadd.s32 1, %s845_s17 }
   0x6   : > { %p32_p0 = scmp.ge.s32.totalorder %s30_s23, 2  ;;  %p157_p1 = scmp.ne.s32.totalorder %s845_s17, %s841_s16 }
   0x7   : > { %p158_p2 = scmp.eq.s32.totalorder %s678_s21, 1  ;;  %p163_p3 = scmp.ne.s32.totalorder %s841_s16, %s837_s15 }
   0x8   : > { %s1038_s23 = smov (%p32_p0, %s30_s23), 0  ;;  %p164_p5 = scmp.eq.s32.totalorder %s679_s22, 1 }
   0x9   : > { %p926_p4 = por %p158_p2, %p157_p1  ;;  %s142_s26 = ssub.s32 %s853_s19, %s1038_s23 }
   0xa   : > { %p682_p6 = scmp.ge.s32.totalorder %s857_s20, 1  ;;  %p145_p7 = scmp.eq.s32.totalorder %s142_s26, 0 }
   0xb   : > { %p933_p8 = por %p164_p5, %p163_p3  ;;  %p212_p9 = scmp.lt.s32.totalorder %s857_s20, 3 }
   0xc   : > { %s939_s28 = scalar_select %p145_p7, %s845_s17, %s147_s24  }
   0xd   : > { %p213_p10 = pnand %p682_p6, %p212_p9 }
   0xe   : > { %s684_s29 = sshll.u32 (!%p213_p10), %s849_s18, 2  ;;  %s256_s14 = sand.u32 (!%p213_p10), 1, %s841_s16  }
   0xf   : > { %216 = sbr.rel (%p213_p10) target bundleno = 568 (0x238), region = 32  ;;  %p260_p11 = scmp.lt.s32.totalorder (!%p213_p10), %s684_s29, 7 }
  0x10   : > { %s683_s21 = sshll.u32 (!%p213_p10), %s256_s14, 5  ;;  %s705_s24 = sshll.u32 (!%p213_p10), %s849_s18, 5 }
  0x11   : > { %s258_s22 = scalar_lea.vmem (!%p213_p10), [#allocation2], %s683_s21  ;;  %s543_s5 = scalar_lea.hbm (!%p213_p10), %s1029_s4, %s705_s24 }
  0x12   : > { %s544_s6 = sshll.u32 (!%p213_p10), %s258_s22, 4  ;;  %s527_s8 = scalar_lea.sflag (!%p213_p10), [#allocation3], %s256_s14  ;;  %s545_s6 = int_to_ptr.vmem [resolvable:$true] %s544_s6 }
  0x13   : > { %s799_s18 = scalar_lea.hbm (!%p213_p10), %s1029_s4, 64 }
  0x14   : > { %s1040_s29 = smov (!%p260_p11, %s684_s29), 7  ;;  %vm299_vm0 = vcmask 64512   ;;  %vm435_vm1 = vcmask 1043456  }
  0x15   : > { %s942_s30 = sshll.u32 %s1040_s29, 2 }
  0x16   : > { %s272_s7 = scalar_lea.vmem %s1026_s1, %s942_s30  ;;  %s266_s10 = scalar_lea.vmem %s1025_s0, %s942_s30 }
  0x17   : > { %v295_v0 = vld [vmem:[%s272_s7] sm:$0xf]  ;;  %v297_v1 = vld [vmem:[%s272_s7 + $0x8] sm:$0xf]  ;;  %v298_v2 = vld [vmem:[%s272_s7 + $0xc] sm:$0xf]  ;;  %s278_s13 = scalar_lea.vmem %s1027_s2, %s942_s30 }
  0x18   : > { %v304_v3 = vsel %vm299_vm0, %v295_v0, 0  ;;  %v342_v4 = vsel %vm299_vm0, %v297_v1, 0  ;;  %v361_v5 = vsel %vm299_vm0, %v298_v2, 0  ;;  %v296_v6 = vld [vmem:[%s272_s7 + $0x4] sm:$0xf]  ;;  %s546_s7 = sshll.u32 %s543_s5, 4  ;;  %s547_s7 = int_to_ptr.hbm [resolvable:$true] %s546_s7 }
  0x19   : > { %313 = vmatpush.bf16.xpose.msra.mxu0 %v304_v3  ;;  %351 = vmatpush.bf16.xpose.msra.mxu2 %v342_v4  ;;  %v323_v7 = vsel %vm299_vm0, %v296_v6, 0  ;;  %v291_v8 = vld [vmem:[%s266_s10] sm:$0xf]  ;;  %v293_v9 = vld [vmem:[%s266_s10 + $0x8] sm:$0xf]  ;;  %s793_s9 = sshra.s32 %s547_s7, 4  ;;  %s794_s9 = int_to_ptr.hbm [resolvable:$true] %s793_s9 }
  0x1a   : > { %370 = vmatpush.bf16.xpose.msra.mxu3 %v361_v5  ;;  %332 = vmatpush.bf16.xpose.msra.mxu1 %v323_v7  ;;  %v294_v10 = vld [vmem:[%s266_s10 + $0xc] sm:$0xf]  ;;  %v292_v11 = vld [vmem:[%s266_s10 + $0x4] sm:$0xf]  ;;  %v428_v44 = vld [vmem:[%s278_s13] sm:$0xf]  ;;  %p800_p1 = scmp.lt.s32.totalorder %s794_s9, %s1029_s4 }
  0x1b   : > { %v437_v45 = vsel %vm435_vm1, %v428_v44, 0  ;;  %v430_v46 = vld [vmem:[%s278_s13 + $0x8] sm:$0xf]  ;;  %v429_v48 = vld [vmem:[%s278_s13 + $0x4] sm:$0xf]  ;;  %s795_s10 = scalar_lea.hbm %s794_s9, 32 }
  0x1c   : > { %v475_v47 = vsel %vm435_vm1, %v430_v46, 0  ;;  %v456_v49 = vsel %vm435_vm1, %v429_v48, 0  ;;  %v431_v50 = vld [vmem:[%s278_s13 + $0xc] sm:$0xf]  ;;  %p796_p12 = scmp.ne.s32.totalorder %s794_s9, %s795_s10  ;;  %p801_p2 = scmp.lt.s32.totalorder %s799_s18, %s795_s10 }
  0x1d   : > { %v494_v51 = vsel %vm435_vm1, %v431_v50, 0 }
  0x1e   : > { %p797_p13 = pnand %p796_p12, %p926_p4  ;;  %p802_p3 = por %p801_p2, %p800_p1 }
  0x20   : > { %692 = vmatmul.msk.bf16.vlgmr.msra.gmra.mxu0 %vm299_vm0, %v291_v8  ;;  %694 = vmatmul.msk.bf16.vlgmr.msra.gmra.mxu2 %vm299_vm0, %v293_v9  ;;  %p798_p0 = pneg %p797_p13 }
  0x21   : > { %695 = vmatmul.msk.bf16.vlgmr.msra.gmra.mxu3 %vm299_vm0, %v294_v10  ;;  %693 = vmatmul.msk.bf16.vlgmr.msra.gmra.mxu1 %vm299_vm0, %v292_v11 }
  0x22   : > { %446 = vmatpush.bf16.msrb.mxu0 %v437_v45  ;;  %484 = vmatpush.bf16.msrb.mxu2 %v475_v47  ;;  %p803_p5 = pnand %p802_p3, %p798_p0 }
  0x23   : > { %465 = vmatpush.bf16.msrb.mxu1 %v456_v49  ;;  %503 = vmatpush.bf16.msrb.mxu3 %v494_v51 }
  0x9d   : > { %v315_v12 = vpop.f32.mrf.mxu0 }
  0x9e   : > { %v376_v13 = vsel %vm299_vm0, %v315_v12, -inf  ;;  %v334_v14 = vpop.f32.mrf.mxu1 }
  0x9f   : > { %377 = vmax.xlane.f32.xlu1 %v376_v13  ;;  %v379_v18 = vsel %vm299_vm0, %v334_v14, -inf }
  0xa3   : > { %v353_v15 = vpop.f32.mrf.mxu2 }
  0xa4   : > { %v372_v16 = vpop.f32.mrf.mxu3  ;;  %v382_v17 = vsel %vm299_vm0, %v353_v15, -inf }
  0xa5   : > { %383 = vmax.xlane.f32.xlu0 %v382_v17  ;;  %v317_v19 = vpop.f32.mrf.mxu0  ;;  %v385_v21 = vsel %vm299_vm0, %v372_v16, -inf }
  0xa6   : > { %v336_v20 = vpop.f32.mrf.mxu1 }
  0xa7   : > { %380 = vmax.xlane.f32.xlu1 %v379_v18 }
  0xab   : > { %v355_v22 = vpop.f32.mrf.mxu2 }
  0xac   : > { %v374_v23 = vpop.f32.mrf.mxu3 }
  0xad   : > { %386 = vmax.xlane.f32.xlu0 %v385_v21 }
 0x112   : > { %v378_v24 = vpop.xlane.xlu1 %377 }
 0x113   : > { %v388_v25 = vsub.f32 %v315_v12, %v378_v24 }
 0x115   : > { %v392_v26 = vmul.f32 1.442695, %v388_v25 }
 0x117   : > { %763 = vpow2.f32 %v392_v26 }
 0x118   : > { %v384_v27 = vpop.xlane.xlu0 %383 }
 0x119   : > { %v390_v28 = vsub.f32 %v353_v15, %v384_v27 }
 0x11a   : > { %v381_v29 = vpop.xlane.xlu1 %380 }
 0x11b   : > { %v396_v30 = vmul.f32 1.442695, %v390_v28  ;;  %v389_v31 = vsub.f32 %v334_v14, %v381_v29 }
 0x11d   : > { %v764_v32 = vpop.eup %763  ;;  %765 = vpow2.f32 %v396_v30  ;;  %v394_v33 = vmul.f32 1.442695, %v389_v31 }
 0x11e   : > { %v400_v34 = vsel %vm299_vm0, %v764_v32, 0.0 }
 0x11f   : > { %767 = vpow2.f32 %v394_v33  ;;  %401 = vadd.xlane.f32.xlu0 %v400_v34 }
 0x120   : > { %v387_v35 = vpop.xlane.xlu0 %386 }
 0x121   : > { %v391_v36 = vsub.f32 %v372_v16, %v387_v35 }
 0x123   : > { %v766_v37 = vpop.eup %765  ;;  %v398_v38 = vmul.f32 1.442695, %v391_v36 }
 0x124   : > { %v406_v39 = vsel %vm299_vm0, %v766_v37, 0.0 }
 0x125   : > { %v768_v40 = vpop.eup %767  ;;  %769 = vpow2.f32 %v398_v38  ;;  %407 = vadd.xlane.f32.xlu2 %v406_v39 }
 0x126   : > { %v403_v41 = vsel %vm299_vm0, %v768_v40, 0.0 }
 0x127   : > { %404 = vadd.xlane.f32.xlu1 %v403_v41 }
 0x12b   : > { %v770_v42 = vpop.eup %769 }
 0x12c   : > { %v409_v43 = vsel %vm299_vm0, %v770_v42, 0.0 }
 0x12d   : > { %410 = vadd.xlane.f32.xlu2 %v409_v43 }
 0x192   : > { %v402_v52 = vpop.xlane.xlu0 %401 }
 0x193   : > { %771 = vrcp.f32 %v402_v52 }
 0x198   : > { %v408_v53 = vpop.xlane.xlu2 %407 }
 0x199   : > { %v772_v54 = vpop.eup %771  ;;  %773 = vrcp.f32 %v408_v53 }
 0x19a   : > { %v416_v55 = vmul.f32 %v772_v54, %v764_v32  ;;  %v405_v56 = vpop.xlane.xlu1 %404 }
 0x19b   : > { %775 = vrcp.f32 %v405_v56 }
 0x19c   : > { %420 = vst.msk [vmem:[%s258_s22] sm:$0xff] %vm299_vm0, %v416_v55  ;;  %v424_v57 = vpack.c.bf16 %v416_v55, %v416_v55 }
 0x19e   : > { %696 = vmatmul.msk.bf16.vlgmr.msrb.gmra.mxu0 %vm299_vm0, %v424_v57 }
 0x19f   : > { %v774_v58 = vpop.eup %773 }
 0x1a0   : > { %v418_v59 = vmul.f32 %v774_v58, %v766_v37  ;;  %v411_v60 = vpop.xlane.xlu2 %410 }
 0x1a1   : > { %v776_v61 = vpop.eup %775  ;;  %777 = vrcp.f32 %v411_v60 }
 0x1a2   : > { %422 = vst.msk [vmem:[%s258_s22 + $0x10] sm:$0xff] %vm299_vm0, %v418_v59  ;;  %v417_v62 = vmul.f32 %v776_v61, %v768_v40  ;;  %v426_v63 = vpack.c.bf16 %v418_v59, %v418_v59 }
 0x1a4   : > { %421 = vst.msk [vmem:[%s258_s22 + $0x8] sm:$0xff] %vm299_vm0, %v417_v62  ;;  %698 = vmatmul.msk.bf16.vlgmr.msrb.gmra.mxu2 %vm299_vm0, %v426_v63  ;;  %v425_v0 = vpack.c.bf16 %v417_v62, %v417_v62 }
 0x1a6   : > { %697 = vmatmul.msk.bf16.vlgmr.msrb.gmra.mxu1 %vm299_vm0, %v425_v0 }
 0x1a7   : > { %v778_v1 = vpop.eup %777 }
 0x1a8   : > { %v419_v2 = vmul.f32 %v778_v1, %v770_v42 }
 0x1aa   : > { %423 = vst.msk [vmem:[%s258_s22 + $0x18] sm:$0xff] %vm299_vm0, %v419_v2  ;;  %v427_v3 = vpack.c.bf16 %v419_v2, %v419_v2 }
 0x1ac   : > { %699 = vmatmul.msk.bf16.vlgmr.msrb.gmra.mxu3 %vm299_vm0, %v427_v3 }
 0x1ad   : > { %806 = shalt.err (!%p803_p5)
}
 0x1ae   : > { %s859_s14 = smov 128   ;;  %s860_s22 = smov 8   ;;  %vm513_vm2 = vcmask 60416  }
 0x1af   : > { %706 = dma.vmem_to_hbm [thread:$0]  (%p926_p4), %s545_s6, 512, %s547_s7, %s527_s8, %s859_s14, %s859_s14, %s860_s22  }
 0x1b0   : > { %s287_s29 = scalar_lea.vmem %s1028_s3, %s942_s30 }
 0x21b   : > { %v448_v4 = vpop.f32.mrf.mxu0 }
 0x21c   : > { %v509_v5 = vpack.c.bf16 %v448_v4, %v448_v4 }
 0x21e   : > { %514 = vst.msk [vmem:[%s287_s29] sm:$0xf] %vm513_vm2, %v509_v5 }
 0x223   : > { %v450_v6 = vpop.f32.mrf.mxu0  ;;  %v467_v7 = vpop.f32.mrf.mxu1 }
 0x224   : > { %v510_v8 = vpack.c.bf16 %v467_v7, %v467_v7 }
 0x226   : > { %515 = vst.msk [vmem:[%s287_s29 + $0x4] sm:$0xf] %vm513_vm2, %v510_v8 }
 0x227   : > { %v486_v9 = vpop.f32.mrf.mxu2 }
 0x228   : > { %v511_v10 = vpack.c.bf16 %v486_v9, %v486_v9 }
 0x22a   : > { %516 = vst.msk [vmem:[%s287_s29 + $0x8] sm:$0xf] %vm513_vm2, %v511_v10 }
 0x22b   : > { %v469_v11 = vpop.f32.mrf.mxu1 }
 0x22f   : > { %v488_v12 = vpop.f32.mrf.mxu2  ;;  %v505_v13 = vpop.f32.mrf.mxu3 }
 0x230   : > { %v512_v14 = vpack.c.bf16 %v505_v13, %v505_v13 }
 0x232   : > { %517 = vst.msk [vmem:[%s287_s29 + $0xc] sm:$0xf] %vm513_vm2, %v512_v14 }
 0x237   : > { %v507_v15 = vpop.f32.mrf.mxu3 }
 0x238 PF: > { %p712_p4 = scmp.ge.s32.totalorder %s857_s20, 2  ;;  %s572_s25 = sand.u32 1, %s837_s15  }
 0x239   : > { %s573_s30 = scalar_lea.sflag [#allocation3], %s572_s25 }
 0x23a   : > { %p709_p6 = pnand %p712_p4, %p933_p8 }
 0x23c   : > { %p710_p7 = pneg %p709_p6 }
 0x23e   : > { %832 = dma.done.wait (%p710_p7), %s573_s30, 512  }
 0x23f   : > { %834 = vsyncadd (%p710_p7), %s573_s30, 4294966784  ;;  %s18_s20 = sadd.s32 1, %s857_s20   ;;  %s1032_s15 = smov %s841_s16 }
 0x240   : > { %p15_p9 = scmp.ge.s32.totalorder %s18_s20, 4   ;;  %s1033_s16 = smov %s845_s17 }
 0x241   : > { %s1034_s17 = smov %s939_s28  ;;  %s1035_s18 = smov %s853_s19 }
 0x242   : > { %s1036_s19 = smov %s1038_s23  ;;  %17 = sbr.rel (!%p15_p9) target bundleno = 4 (0x4), region = 85 }
 0x247   :  { %579 = vsyncpa [#allocation3], 1 }
 0x248   :  { %581 = vsyncpa [#allocation3 + $0x1], 1 }

</bundles_post_ra>
